<compile_context>
chip_gen: v6e
topology: v6e:2x2x1
jax: 0.10.0
libtpu: 0.0.40
codegen_flags: <defaults>
</compile_context>

<pallas_src>
import functools

import jax
import jax.numpy as jnp
import numpy as np
from jax.experimental import pallas as pl
from jax.experimental.pallas import tpu as pltpu


def _dice_reduce_kernel(logits_ref, tgt_ref, inter_ref, union_ref, *,
                        num_classes, ignore_index, hw, tile):
    i = pl.program_id(1)                       # pixel-tile index (reduction axis)

    @pl.when(i == 0)
    def _():
        inter_ref[...] = jnp.zeros_like(inter_ref)
        union_ref[...] = jnp.zeros_like(union_ref)

    logits = logits_ref[0].astype(jnp.float32)  # (C, TILE), f32 math on all gens
    tgt = tgt_ref[0].astype(jnp.int32)          # (1, TILE), widened in VMEM only

    valid = tgt != ignore_index                 # (1, TILE) bool

    if hw % tile != 0:
        # Ragged last tile: the edge block contains undefined lanes.  Mask both
        # the validity AND the logits (exp(garbage) could be Inf/NaN and would
        # survive a multiply-by-zero).
        pix = i * tile + jax.lax.broadcasted_iota(jnp.int32, tgt.shape, 1)
        in_range = pix < hw
        valid = jnp.logical_and(valid, in_range)
        logits = jnp.where(in_range, logits, 0.0)

    # Softmax over the class (sublane) axis.
    m = jnp.max(logits, axis=0, keepdims=True)
    e = jnp.exp(logits - m)
    d = jnp.sum(e, axis=0, keepdims=True)
    # EUP approximate reciprocal + one Newton step: ~f32 exact, and the divide
    # stays off the VALU slot (the binding unit on v7x).
    r = pl.reciprocal(d, approx=True)
    r = r * (2.0 - d * r)
    p = e * r                                   # (C, TILE)

    # Fused masking.  sel == (one_hot(clamped target) * valid_mask) as a bool:
    # a (C,1) iota broadcast against the (1,TILE) target, no (C,TILE) iota temp.
    class_iota = jax.lax.broadcasted_iota(jnp.int32, (num_classes, 1), 0)
    tgt_c = jnp.clip(tgt, 0, num_classes - 1)               # (1, TILE)
    sel = jnp.logical_and(valid, class_iota == tgt_c)       # (C, TILE) bool

    inter_term = jnp.where(sel, p, 0.0)                     # p * one_hot * valid
    union_term = jnp.where(valid, p, 0.0) + sel.astype(jnp.float32)

    # Accumulate straight into the resident per-batch output blocks.
    inter_ref[...] += jnp.sum(inter_term, axis=1, keepdims=True)[None, :, :]
    union_ref[...] += jnp.sum(union_term, axis=1, keepdims=True)[None, :, :]


def _vmem_capacity_bytes():
    """Physical VMEM per core; conservative (v7x-sized) fallback if unknown."""
    try:
        return int(pltpu.get_tpu_info().vmem_capacity_bytes)
    except Exception:
        return 64 * 1024 * 1024


def _plan(hw, c, logit_isz, tgt_isz, max_tile):
    """Pick pixel-tile width and a matching vmem_limit.

    Per-pixel VMEM cost model:
      * double-buffered input blocks: 2 * (C*logit_isz + tgt_isz)
      * live in-kernel f32 temporaries: ~10 * C * 4 bytes (conservative; the
        review flagged that the previous input-only budget could overshoot).
    Tiles are as large as the budget allows: per-grid-step overhead is
    ~0.35us, so small blocks leave HBM bandwidth on the table.
    """
    vmem_cap = _vmem_capacity_bytes()
    if vmem_cap >= 96 * 1024 * 1024:     # 128 MiB parts (v5e / v6e)
        cap = 96 * 1024 * 1024
    else:                                # 64 MiB parts (v7x)
        cap = 44 * 1024 * 1024
    slack = 4 * 1024 * 1024
    per_pixel = 2 * (c * logit_isz + tgt_isz) + 10 * c * 4
    t = min(max_tile, (cap - slack) // per_pixel)
    t = max(128, (t // 128) * 128)       # keep the lane dim a multiple of 128
    if hw <= t:
        t = hw                           # single full-row tile (always legal)
    est = t * per_pixel + slack
    vmem_limit = int(min(cap, max(32 * 1024 * 1024, est)))
    return t, vmem_limit


def multi_dice_loss(prediction, target, *, ignore_index=255, epsilon=1e-6,
                    max_tile_pixels=512 * 1024, downcast_logits_to_bf16=False):
    """Forward pass of MultiDiceLoss.

    prediction: (N, C, H, W) float (f32 or bf16); target: (N, H, W) int.
    """
    N, C, H, W = prediction.shape
    HW = H * W

    if downcast_logits_to_bf16:
        # Opt-in: halves the dominant HBM stream (~1.8x on mem-bound v5e/v6e)
        # at the cost of ~1e-3 relative perturbation of the logits.
        prediction = prediction.astype(jnp.bfloat16)

    # Contiguous views only -- no HBM transpose, no jnp.pad of the big array,
    # and no dtype-widening pre-pass over the target.
    logits = prediction.reshape(N, C, HW)
    if jnp.dtype(target.dtype).itemsize > 4:
        target = target.astype(jnp.int32)        # 64-bit ints aren't TPU-native
    tgt = target.reshape(N, 1, HW)

    logit_isz = jnp.dtype(logits.dtype).itemsize
    tgt_isz = jnp.dtype(tgt.dtype).itemsize
    tile, vmem_limit = _plan(HW, C, logit_isz, tgt_isz, max_tile_pixels)
    n_tiles = pl.cdiv(HW, tile)

    kernel = functools.partial(_dice_reduce_kernel, num_classes=C,
                               ignore_index=ignore_index, hw=HW, tile=tile)

    inter, union = pl.pallas_call(
        kernel,
        out_shape=(jax.ShapeDtypeStruct((N, C, 1), jnp.float32),
                   jax.ShapeDtypeStruct((N, C, 1), jnp.float32)),
        grid_spec=pltpu.PrefetchScalarGridSpec(
            num_scalar_prefetch=0,
            grid=(N, n_tiles),
            in_specs=[
                pl.BlockSpec((1, C, tile), lambda n, i: (n, 0, i)),
                pl.BlockSpec((1, 1, tile), lambda n, i: (n, 0, i)),
            ],
            out_specs=[
                pl.BlockSpec((1, C, 1), lambda n, i: (n, 0, 0)),
                pl.BlockSpec((1, C, 1), lambda n, i: (n, 0, 0)),
            ],
        ),
        compiler_params=pltpu.CompilerParams(
            dimension_semantics=("parallel", "arbitrary"),
            vmem_limit_bytes=vmem_limit),
    )(logits, tgt)

    # Tiny epilogue in plain JAX: sum per-batch partials, dice, mean.
    inter = jnp.sum(inter[:, :, 0], axis=0)   # (C,)
    union = jnp.sum(union[:, :, 0], axis=0)   # (C,)
    dice = (2.0 * inter + epsilon) / (union + epsilon)
    return 1.0 - jnp.mean(dice)


def _reference(prediction, target, ignore_index=255, epsilon=1e-6):
    N, C, H, W = prediction.shape
    p = jax.nn.softmax(prediction.astype(jnp.float32), axis=1)
    valid = (target != ignore_index)[:, None, :, :].astype(jnp.float32)
    t1h = jax.nn.one_hot(jnp.clip(target, 0, C - 1), C, axis=1,
                         dtype=jnp.float32)
    p = p * valid
    t1h = t1h * valid
    inter = jnp.sum(p * t1h, axis=(0, 2, 3))
    union = jnp.sum(p, axis=(0, 2, 3)) + jnp.sum(t1h, axis=(0, 2, 3))
    dice = (2.0 * inter + epsilon) / (union + epsilon)
    return 1.0 - jnp.mean(dice)


if __name__ == "__main__":
    key = jax.random.PRNGKey(0)
    k1, k2, k3, k4 = jax.random.split(key, 4)

    # Main check: module-sized inputs, f32 logits, int32 target.
    N, C, H, W = 2, 4, 16, 16
    prediction = jax.random.normal(k1, (N, C, H, W), dtype=jnp.float32)
    target = jax.random.randint(k2, (N, H, W), 0, C, dtype=jnp.int32)
    target = target.at[:, :2, :].set(255)           # some ignored pixels

    loss = jax.block_until_ready(multi_dice_loss(prediction, target))
    ref = jax.block_until_ready(_reference(prediction, target))
    np.testing.assert_allclose(np.asarray(loss), np.asarray(ref),
                               rtol=1e-5, atol=1e-5)

    # Second check: force a small tile so the ragged-last-tile (in-kernel
    # masking) path is exercised: HW = 324, tile = 128 -> 3 tiles, last partial.
    N2, C2, H2, W2 = 2, 5, 18, 18
    pred2 = jax.random.normal(k3, (N2, C2, H2, W2), dtype=jnp.float32)
    tgt2 = jax.random.randint(k4, (N2, H2, W2), 0, C2, dtype=jnp.int32)
    tgt2 = tgt2.at[:, -3:, :].set(255)
    loss2 = jax.block_until_ready(
        multi_dice_loss(pred2, tgt2, max_tile_pixels=128))
    ref2 = jax.block_until_ready(_reference(pred2, tgt2))
    np.testing.assert_allclose(np.asarray(loss2), np.asarray(ref2),
                               rtol=1e-5, atol=1e-5)

    # Third check: opt-in bf16 logits path (kernel math stays f32, so comparing
    # against the reference evaluated on the same bf16-cast logits is exact to
    # f32 accumulation order).
    loss3 = jax.block_until_ready(
        multi_dice_loss(prediction, target, downcast_logits_to_bf16=True))
    ref3 = jax.block_until_ready(
        _reference(prediction.astype(jnp.bfloat16), target))
    np.testing.assert_allclose(np.asarray(loss3), np.asarray(ref3),
                               rtol=1e-5, atol=1e-5)

    print("KERNEL_OK")
</pallas_src>

<mosaic_0001>
module attributes {stable_mosaic.version = 11 : i64} {
  func.func @_dice_reduce_kernel(%arg0: i32, %arg1: i32, %arg2: memref<1x4x256xf32, #tpu.memory_space<vmem>>, %arg3: memref<1x1x256xi32, #tpu.memory_space<vmem>>, %arg4: memref<1x4x1xf32, #tpu.memory_space<vmem>>, %arg5: memref<1x4x1xf32, #tpu.memory_space<vmem>>) attributes {dimension_semantics = [#tpu.dimension_semantics<parallel>, #tpu.dimension_semantics<arbitrary>], iteration_bounds = array<i64: 2, 1>, scalar_prefetch = 0 : i64, scratch_operands = 0 : i64, tpu.core_type = #tpu.core_type<tc>, window_params = [{transform_indices = @transform_0, window_bounds = array<i64: 1, 4, 256>}, {transform_indices = @transform_1, window_bounds = array<i64: 1, 1, 256>}, {transform_indices = @transform_2, window_bounds = array<i64: 1, 4, 1>}, {transform_indices = @transform_3, window_bounds = array<i64: 1, 4, 1>}]} {
    %c0_i32 = arith.constant 0 : i32
    %0 = arith.cmpi eq, %arg1, %c0_i32 : i32
    %1 = arith.extui %0 : i1 to i32
    %c0_i32_0 = arith.constant 0 : i32
    %2 = arith.cmpi ne, %1, %c0_i32_0 : i32
    scf.if %2 {
      %cst_25 = arith.constant 0.000000e+00 : f32
      %54 = vector.broadcast %cst_25 : f32 to vector<1x4x1xf32>
      %c0_26 = arith.constant 0 : index
      %c0_27 = arith.constant 0 : index
      %c0_28 = arith.constant 0 : index
      %55 = vector.load %arg4[%c0_26, %c0_27, %c0_28] : memref<1x4x1xf32, #tpu.memory_space<vmem>>, vector<1x4x1xf32>
      tpu.vector_store %arg4[%c0_26, %c0_27, %c0_28], %54 {strides = array<i32>} : memref<1x4x1xf32, #tpu.memory_space<vmem>>, vector<1x4x1xf32>,
      %cst_29 = arith.constant 0.000000e+00 : f32
      %56 = vector.broadcast %cst_29 : f32 to vector<1x4x1xf32>
      %c0_30 = arith.constant 0 : index
      %c0_31 = arith.constant 0 : index
      %c0_32 = arith.constant 0 : index
      %57 = vector.load %arg5[%c0_30, %c0_31, %c0_32] : memref<1x4x1xf32, #tpu.memory_space<vmem>>, vector<1x4x1xf32>
      tpu.vector_store %arg5[%c0_30, %c0_31, %c0_32], %56 {strides = array<i32>} : memref<1x4x1xf32, #tpu.memory_space<vmem>>, vector<1x4x1xf32>,
    } else {
    }
    %c0 = arith.constant 0 : index
    %c0_1 = arith.constant 0 : index
    %c0_2 = arith.constant 0 : index
    %3 = vector.load %arg2[%c0, %c0_1, %c0_2] : memref<1x4x256xf32, #tpu.memory_space<vmem>>, vector<1x4x256xf32>
    %4 = vector.shape_cast %3 : vector<1x4x256xf32> to vector<4x256xf32>
    %c0_3 = arith.constant 0 : index
    %c0_4 = arith.constant 0 : index
    %c0_5 = arith.constant 0 : index
    %5 = vector.load %arg3[%c0_3, %c0_4, %c0_5] : memref<1x1x256xi32, #tpu.memory_space<vmem>>, vector<1x1x256xi32>
    %6 = vector.shape_cast %5 : vector<1x1x256xi32> to vector<1x256xi32>
    %c255_i32 = arith.constant 255 : i32
    %7 = vector.broadcast %c255_i32 : i32 to vector<1x256xi32>
    %8 = arith.cmpi ne, %6, %7 : vector<1x256xi32>
    %cst = arith.constant dense<0xFF800000> : vector<256xf32>
    %9 = vector.multi_reduction <maximumf>, %4, %cst [0] : vector<4x256xf32> to vector<256xf32>
    %10 = vector.shape_cast %9 : vector<256xf32> to vector<1x256xf32>
    %11 = vector.broadcast %10 : vector<1x256xf32> to vector<4x256xf32>
    %12 = arith.subf %4, %11 : vector<4x256xf32>
    %13 = math.exp %12 : vector<4x256xf32>
    %cst_6 = arith.constant dense<0.000000e+00> : vector<256xf32>
    %14 = vector.multi_reduction <add>, %13, %cst_6 [0] : vector<4x256xf32> to vector<256xf32>
    %15 = vector.shape_cast %14 : vector<256xf32> to vector<1x256xf32>
    %16 = tpu.reciprocal %15 {approx = true} : vector<1x256xf32> -> vector<1x256xf32>
    %17 = arith.mulf %15, %16 : vector<1x256xf32>
    %cst_7 = arith.constant 2.000000e+00 : f32
    %18 = vector.broadcast %cst_7 : f32 to vector<1x256xf32>
    %19 = arith.subf %18, %17 : vector<1x256xf32>
    %20 = arith.mulf %16, %19 : vector<1x256xf32>
    %21 = vector.broadcast %20 : vector<1x256xf32> to vector<4x256xf32>
    %22 = arith.mulf %13, %21 : vector<4x256xf32>
    %23 = tpu.iota {dimensions = array<i32: 0>} : vector<4x1xi32>
    %c0_i32_8 = arith.constant 0 : i32
    %c3_i32 = arith.constant 3 : i32
    %24 = vector.broadcast %c0_i32_8 : i32 to vector<1x256xi32>
    %25 = arith.maxsi %24, %6 : vector<1x256xi32>
    %26 = vector.broadcast %c3_i32 : i32 to vector<1x256xi32>
    %27 = arith.minsi %26, %25 : vector<1x256xi32>
    %28 = vector.broadcast %23 : vector<4x1xi32> to vector<4x256xi32>
    %29 = vector.broadcast %27 : vector<1x256xi32> to vector<4x256xi32>
    %30 = arith.cmpi eq, %28, %29 : vector<4x256xi32>
    %31 = vector.broadcast %8 : vector<1x256xi1> to vector<4x256xi1>
    %32 = arith.andi %31, %30 : vector<4x256xi1>
    %cst_9 = arith.constant 0.000000e+00 : f32
    %33 = vector.broadcast %cst_9 : f32 to vector<4x256xf32>
    %34 = arith.select %32, %22, %33 : vector<4x256xi1>, vector<4x256xf32>
    %cst_10 = arith.constant 0.000000e+00 : f32
    %35 = vector.shape_cast %8 : vector<1x256xi1> to vector<1x256xi1>
    %36 = vector.broadcast %35 : vector<1x256xi1> to vector<4x256xi1>
    %37 = vector.broadcast %cst_10 : f32 to vector<4x256xf32>
    %38 = arith.select %36, %22, %37 : vector<4x256xi1>, vector<4x256xf32>
    %39 = arith.extui %32 : vector<4x256xi1> to vector<4x256xi32>
    %40 = arith.sitofp %39 : vector<4x256xi32> to vector<4x256xf32>
    %41 = arith.addf %38, %40 : vector<4x256xf32>
    %c0_11 = arith.constant 0 : index
    %c0_12 = arith.constant 0 : index
    %c0_13 = arith.constant 0 : index
    %42 = vector.load %arg4[%c0_11, %c0_12, %c0_13] : memref<1x4x1xf32, #tpu.memory_space<vmem>>, vector<1x4x1xf32>
    %cst_14 = arith.constant dense<0.000000e+00> : vector<4xf32>
    %43 = vector.multi_reduction <add>, %34, %cst_14 [1] : vector<4x256xf32> to vector<4xf32>
    %44 = vector.shape_cast %43 : vector<4xf32> to vector<4x1xf32>
    %45 = vector.shape_cast %44 : vector<4x1xf32> to vector<1x4x1xf32>
    %46 = arith.addf %42, %45 : vector<1x4x1xf32>
    %c0_15 = arith.constant 0 : index
    %c0_16 = arith.constant 0 : index
    %c0_17 = arith.constant 0 : index
    %47 = vector.load %arg4[%c0_15, %c0_16, %c0_17] : memref<1x4x1xf32, #tpu.memory_space<vmem>>, vector<1x4x1xf32>
    tpu.vector_store %arg4[%c0_15, %c0_16, %c0_17], %46 {strides = array<i32>} : memref<1x4x1xf32, #tpu.memory_space<vmem>>, vector<1x4x1xf32>,
    %c0_18 = arith.constant 0 : index
    %c0_19 = arith.constant 0 : index
    %c0_20 = arith.constant 0 : index
    %48 = vector.load %arg5[%c0_18, %c0_19, %c0_20] : memref<1x4x1xf32, #tpu.memory_space<vmem>>, vector<1x4x1xf32>
    %cst_21 = arith.constant dense<0.000000e+00> : vector<4xf32>
    %49 = vector.multi_reduction <add>, %41, %cst_21 [1] : vector<4x256xf32> to vector<4xf32>
    %50 = vector.shape_cast %49 : vector<4xf32> to vector<4x1xf32>
    %51 = vector.shape_cast %50 : vector<4x1xf32> to vector<1x4x1xf32>
    %52 = arith.addf %48, %51 : vector<1x4x1xf32>
    %c0_22 = arith.constant 0 : index
    %c0_23 = arith.constant 0 : index
    %c0_24 = arith.constant 0 : index
    %53 = vector.load %arg5[%c0_22, %c0_23, %c0_24] : memref<1x4x1xf32, #tpu.memory_space<vmem>>, vector<1x4x1xf32>
    tpu.vector_store %arg5[%c0_22, %c0_23, %c0_24], %52 {strides = array<i32>} : memref<1x4x1xf32, #tpu.memory_space<vmem>>, vector<1x4x1xf32>,
    return
  }
  func.func @transform_0(%arg0: i32, %arg1: i32) -> (i32, i32, i32) {
    %c0_i32 = arith.constant 0 : i32
    %c0_i32_0 = arith.constant 0 : i32
    return %arg0, %c0_i32, %arg1 : i32, i32, i32
  }
  func.func @transform_1(%arg0: i32, %arg1: i32) -> (i32, i32, i32) {
    %c0_i32 = arith.constant 0 : i32
    %c0_i32_0 = arith.constant 0 : i32
    return %arg0, %c0_i32, %arg1 : i32, i32, i32
  }
  func.func @transform_2(%arg0: i32, %arg1: i32) -> (i32, i32, i32) {
    %c0_i32 = arith.constant 0 : i32
    %c0_i32_0 = arith.constant 0 : i32
    %c0_i32_1 = arith.constant 0 : i32
    return %arg0, %c0_i32, %c0_i32_0 : i32, i32, i32
  }
  func.func @transform_3(%arg0: i32, %arg1: i32) -> (i32, i32, i32) {
    %c0_i32 = arith.constant 0 : i32
    %c0_i32_0 = arith.constant 0 : i32
    %c0_i32_1 = arith.constant 0 : i32
    return %arg0, %c0_i32, %c0_i32_0 : i32, i32, i32
  }
}

</mosaic_0001>

<bundles_post_ra>
// kernel: tpu_custom_call.1
= control target key start
LH: loop header
LB: loop body
LE: loop exit
PB: predicated region body
PF: predicated region fallthrough
CT: control target
= control target key end

     0   :  { %9 = vsyncpa [#allocation3], 0  ;;  %s903_s0 = inlined_call_operand.hbm [shape: f32[2,4,256], index: 0, kind: input, shape index: {}]   ;;  %s904_s1 = inlined_call_operand.hbm [shape: s32[2,1,256], index: 1, kind: input, shape index: {}]   ;;  %s905_s2 = inlined_call_operand.vmem [shape: f32[2,4,1], index: 2, kind: output, shape index: {0}]   ;;  %s906_s3 = inlined_call_operand.vmem [shape: f32[2,4,1], index: 3, kind: output, shape index: {1}]  }
   0x1   :  { %11 = vsyncpa [#allocation3 + $0x1], 0 }
   0x2   :  { %12 = vsyncpa [#allocation5], 0 }
   0x3   :  { %14 = vsyncpa [#allocation5 + $0x1], 0  ;;  %s741_s12 = smov 0   ;;  %s743_s13 = smov 0  }
   0x4   :  { %s745_s14 = smov 0   ;;  %s747_s15 = smov 0  }
   0x5   :  { %s749_s16 = smov 0   ;;  %s751_s17 = smov 0  }
   0x6 LB: > { %s515_s18 = sadd.s32 4294967295, %s715_s17   ;;  %s32_s19 = sadd.s32 1, %s711_s16  ;;  %s715_s17 = sphi %s751_s17, %s20_s17   ;;  %s711_s16 = sphi %s749_s16, %s915_s16   ;;  %s707_s15 = sphi %s747_s15, %s914_s15   ;;  %s703_s14 = sphi %s745_s14, %s913_s14   ;;  %s699_s13 = sphi %s743_s13, %s912_s13   ;;  %s695_s12 = sphi %s741_s12, %s911_s12  }
   0x7   : > { %p34_p0 = scmp.ge.s32.totalorder %s32_s19, 2  ;;  %s41_s20 = sadd.s32 1, %s703_s14 }
   0x8   : > { %p48_p1 = scmp.ne.s32.totalorder %s703_s14, %s699_s13  ;;  %p49_p2 = scmp.eq.s32.totalorder %s715_s17, 0 }
   0x9   : > { %s917_s19 = smov (%p34_p0, %s32_s19), 0  ;;  %p54_p4 = scmp.ne.s32.totalorder %s699_s13, %s695_s12 }
   0xa   : > { %p777_p3 = por %p49_p2, %p48_p1  ;;  %s36_s22 = ssub.s32 %s711_s16, %s917_s19 }
   0xb   : > { %p55_p5 = scmp.eq.s32.totalorder %s515_s18, 0  ;;  %p39_p6 = scmp.eq.s32.totalorder %s36_s22, 0 }
   0xc   : > { %p547_p8 = scmp.lt.s32.totalorder %s715_s17, 2  ;;  %s793_s25 = sand.u32 1, %s703_s14  }
   0xd   : > { %p784_p7 = por %p55_p5, %p54_p4  ;;  %s534_s26 = sshll.u32 %s711_s16, 7 }
   0xe   : > { %s790_s24 = scalar_select %p39_p6, %s703_s14, %s41_s20  }
   0xf   : > { %s519_s27 = sshll.u32 %s793_s25, 3  ;;  %s170_s30 = scalar_lea.hbm %s903_s0, %s534_s26 }
  0x10   : > { %s162_s4 = scalar_lea.vmem [#allocation2], %s519_s27  ;;  %p802_p9 = pnand %p547_p8, %p777_p3 }
  0x11   : > { %s172_s5 = sshll.u32 %s162_s4, 4  ;;  %p525_p10 = scmp.ge.s32.totalorder %s715_s17, 1  ;;  %s173_s5 = int_to_ptr.vmem [resolvable:$true] %s172_s5 }
  0x12   : > { %p198_p11 = scmp.lt.s32.totalorder %s715_s17, 3  ;;  %s159_s7 = scalar_lea.sflag [#allocation3], %s793_s25 }
  0x13   : > { %p607_p12 = pneg %p802_p9  ;;  %s618_s8 = scalar_lea.vmem %s173_s5, 128 }
  0x14   : > { %p619_p13 = scmp.ne.s32.totalorder %s173_s5, %s618_s8  ;;  %s717_s9 = smov [#allocation2]  }
  0x15   : > { %s623_s10 = sshll.u32 %s717_s9, 4  ;;  %s624_s10 = int_to_ptr.vmem [resolvable:$false] %s623_s10 }
  0x16   : > { %p621_p0 = pnand %p619_p13, %p607_p12  ;;  %s625_s11 = scalar_lea.vmem %s624_s10, 256 }
  0x17   : > { %p626_p2 = scmp.lt.s32.totalorder %s173_s5, %s624_s10  ;;  %p627_p3 = scmp.lt.s32.totalorder %s625_s11, %s618_s8 }
  0x18   : > { %p622_p1 = pneg %p621_p0 }
  0x19   : > { %p628_p4 = por %p627_p3, %p626_p2 }
  0x1b   : > { %p629_p5 = pnand %p628_p4, %p622_p1 }
  0x1d   : > { %632 = shalt.err (!%p629_p5)
}
  0x1e   : > { %543 = dma.hbm_to_vmem [thread:$0]  (!%p802_p9), %s170_s30, 128, %s173_s5, %s159_s7  }
  0x1f   : > { %p820_p6 = pnand %p525_p10, %p198_p11  ;;  %s522_s18 = sshll.u32 %s793_s25, 1 }
  0x20   : > { %s535_s20 = sshll.u32 %s711_s16, 5  ;;  %s183_s27 = scalar_lea.vmem [#allocation4], %s522_s18 }
  0x21   : > { %s191_s26 = scalar_lea.hbm %s904_s1, %s535_s20  ;;  %s193_s28 = sshll.u32 %s183_s27, 4  ;;  %s194_s28 = int_to_ptr.vmem [resolvable:$true] %s193_s28 }
  0x22   : > { %s180_s29 = scalar_lea.sflag [#allocation5], %s793_s25  ;;  %s646_s4 = scalar_lea.vmem %s194_s28, 32 }
  0x23   : > { %p647_p8 = scmp.ne.s32.totalorder %s194_s28, %s646_s4  ;;  %s718_s30 = smov [#allocation4]  }
  0x24   : > { %s651_s5 = sshll.u32 %s718_s30, 4  ;;  %s652_s5 = int_to_ptr.vmem [resolvable:$false] %s651_s5 }
  0x25   : > { %p649_p13 = pnand %p647_p8, %p607_p12  ;;  %s653_s7 = scalar_lea.vmem %s652_s5, 64 }
  0x26   : > { %p654_p10 = scmp.lt.s32.totalorder %s194_s28, %s652_s5  ;;  %p655_p11 = scmp.lt.s32.totalorder %s653_s7, %s646_s4 }
  0x27   : > { %p650_p0 = pneg %p649_p13 }
  0x28   : > { %p656_p1 = por %p655_p11, %p654_p10 }
  0x2a   : > { %p657_p2 = pnand %p656_p1, %p650_p0 }
  0x2c   : > { %660 = shalt.err (!%p657_p2)
}
  0x2d   : > { %546 = dma.hbm_to_vmem [thread:$0]  (!%p802_p9), %s191_s26, 32, %s194_s28, %s180_s29  }
  0x2e   : > { %202 = sbr.rel (%p820_p6) target bundleno = 281 (0x119), region = 28  ;;  %s204_s25 = sand.u32 (!%p820_p6), 1, %s699_s13  }
  0x2f   : > { %s526_s8 = sshll.u32 (!%p820_p6), %s204_s25, 3  ;;  %s205_s9 = scalar_lea.sflag (!%p820_p6), [#allocation3], %s204_s25 }
  0x30   : > { %s208_s10 = scalar_lea.vmem (!%p820_p6), [#allocation2], %s526_s8 }
  0x33   : > { %686 = dma.done.wait (%p784_p7), %s205_s9, 128  }
  0x34   : > { %688 = vsyncadd (%p784_p7), %s205_s9, 4294967168  ;;  %s527_s11 = sshll.u32 %s204_s25, 1  ;;  %s214_s18 = scalar_lea.sflag [#allocation5], %s204_s25 }
  0x35   : > { %s842_s20 = scalar_lea.vmem [#allocation4], %s527_s11 }
  0x36   : > { %690 = dma.done.wait (%p784_p7), %s214_s18, 32  }
  0x37   : > { %692 = vsyncadd (%p784_p7), %s214_s18, 4294967264  ;;  %p250_p9 = scmp.lt.s32.totalorder %s707_s15, 1  ;;  %vm262_vm0 = vcmask 3072   ;;  %vm271_vm1 = vcmask 1043456   ;;  %v719_v0 = vmov 0.0   ;;  %v265_v1 = vld [vmem:[%s208_s10] sm:$0xff]  ;;  %v323_v37 = vlaneseq }
  0x38   : > { %v269_v2 = vcombine.high %v265_v1, %v265_v1  ;;  %v272_v3 = vsel %vm271_vm1, %v265_v1, -inf  ;;  %v266_v36 = vld [vmem:[%s842_s20] sm:$0x3]  ;;  %v720_v43 = vmov 0  }
  0x39   : > { %s919_s15 = smov (!%p250_p9, %s707_s15), 1  ;;  %v273_v4 = vrot.slane %v272_v3, 4  ;;  %vm325_vm2 = vcmp.gt.s32.totalorder %v266_v36, 0  ;;  %v324_v39 = vshrl.u32 %v323_v37, 7  ;;  %vm267_vm3 = vcmp.ne.s32.totalorder %v266_v36, 255 }
  0x3a   : > { %s528_s6 = sshll.u32 %s919_s15, 2  ;;  %v279_v5 = vsel %vm271_vm1, %v269_v2, -inf  ;;  %v326_v38 = vsel %vm325_vm2, %v266_v36, 0  ;;  %v339_v44 = vsel %vm267_vm3, 1, %v720_v43 }
  0x3b   : > { %s858_s22 = scalar_lea.vmem %s905_s2, %s528_s6  ;;  %v274_v6 = vmax.f32 %v272_v3, %v273_v4  ;;  %v280_v7 = vrot.slane %v279_v5, 4  ;;  %vm327_vm4 = vcmp.lt.s32.totalorder %v326_v38, 3  ;;  %v331_v40 = vsub.s32 0, %v324_v39  ;;  %s257_s27 = scalar_lea.vmem %s906_s3, %s528_s6 }
  0x3c   : > { %263 = vst.msk [vmem:[%s858_s22] sm:$0xf] %vm262_vm0, %v719_v0  ;;  %v328_v42 = vsel %vm327_vm4, %v326_v38, 3  ;;  %v335_v46 = vsub.s32 1, %v324_v39  ;;  %264 = vst.msk [vmem:[%s257_s27] sm:$0xf] %vm262_vm0, %v719_v0 }
  0x3d   : > { %v275_v8 = vrot.slane %v274_v6, 2  ;;  %v281_v9 = vmax.f32 %v279_v5, %v280_v7  ;;  %v332_v50 = vrot.slane %v328_v42, %v331_v40  ;;  %v343_v51 = vrot.slane %v339_v44, %v331_v40 }
  0x3e   : > { %v336_v54 = vrot.slane %v328_v42, %v335_v46  ;;  %v347_v55 = vrot.slane %v339_v44, %v335_v46 }
  0x3f   : > { %v276_v10 = vmax.f32 %v274_v6, %v275_v8  ;;  %v282_v11 = vrot.slane %v281_v9, 2  ;;  %vm337_vm5 = vcmp.eq.s32.totalorder %v324_v39, %v332_v50  ;;  %vm348_vm6 = vcmp.eq.s32.totalorder %v343_v51, 1 }
  0x40   : > { %vm338_vm7 = vcmp.eq.s32.totalorder %v324_v39, %v336_v54  ;;  %vm349_vm8 = vcmp.eq.s32.totalorder %v347_v55, 1  ;;  %vm350_vm9 = vmand %vm348_vm6, %vm337_vm5 }
  0x41   : > { %v277_v12 = vrot.slane %v276_v10, 1  ;;  %v283_v13 = vmax.f32 %v281_v9, %v282_v11  ;;  %v530_v59 = vsel %vm350_vm9, 1.0, %v719_v0  ;;  %vm351_vm10 = vmand %vm349_vm8, %vm338_vm7 }
  0x42   : > { %v531_v63 = vsel %vm351_vm10, 1.0, %v719_v0 }
  0x43   : > { %v278_v14 = vmax.f32 %v276_v10, %v277_v12  ;;  %v284_v15 = vrot.slane %v283_v13, 1  ;;  %v365_v11 = vld [vmem:[%s858_s22] sm:$0xf] }
  0x45   : > { %v285_v16 = vmax.f32 %v283_v13, %v284_v15 }
  0x47   : > { %v288_v17 = vcombine.low %v278_v14, %v285_v16  ;;  %v374_v14 = vld [vmem:[%s257_s27] sm:$0xf] }
  0x49   : > { %v290_v18 = vsub.f32 %v265_v1, %v288_v17 }
  0x4b   : > { %v291_v19 = vmul.f32 1.442695, %v290_v18 }
  0x4d   : > { %599 = vpow2.f32 %v291_v19 }
  0x5a   : > { %v600_v20 = vpop.eup %599 }
  0x5b   : > { %v294_v21 = vcombine.high %v600_v20, %v600_v20  ;;  %v296_v22 = vsel %vm271_vm1, %v600_v20, 0.0 }
  0x5c   : > { %v297_v23 = vrot.slane %v296_v22, 4 }
  0x5d   : > { %v303_v24 = vsel %vm271_vm1, %v294_v21, 0.0 }
  0x5e   : > { %v298_v25 = vadd.f32 %v297_v23, %v296_v22  ;;  %v304_v26 = vrot.slane %v303_v24, 4 }
  0x60   : > { %v299_v27 = vrot.slane %v298_v25, 2  ;;  %v305_v28 = vadd.f32 %v304_v26, %v303_v24 }
  0x62   : > { %v300_v29 = vadd.f32 %v299_v27, %v298_v25  ;;  %v306_v30 = vrot.slane %v305_v28, 2 }
  0x64   : > { %v301_v31 = vrot.slane %v300_v29, 1  ;;  %v307_v32 = vadd.f32 %v306_v30, %v305_v28 }
  0x66   : > { %v302_v33 = vadd.f32 %v301_v31, %v300_v29  ;;  %v308_v34 = vrot.slane %v307_v32, 1 }
  0x68   : > { %v309_v35 = vadd.f32 %v308_v34, %v307_v32  ;;  %601 = vrcp.f32 %v302_v33 }
  0x6a   : > { %603 = vrcp.f32 %v309_v35 }
  0x75   : > { %v602_v41 = vpop.eup %601 }
  0x76   : > { %v312_v45 = vmul.f32 %v602_v41, %v302_v33 }
  0x77   : > { %v604_v47 = vpop.eup %603 }
  0x78   : > { %v313_v48 = vmul.f32 %v604_v47, %v309_v35  ;;  %v314_v49 = vsub.f32 2.0, %v312_v45 }
  0x7a   : > { %v315_v52 = vsub.f32 2.0, %v313_v48  ;;  %v316_v53 = vmul.f32 %v602_v41, %v314_v49 }
  0x7c   : > { %v317_v56 = vmul.f32 %v604_v47, %v315_v52 }
  0x7e   : > { %v320_v57 = vcombine.low %v316_v53, %v317_v56 }
  0x80   : > { %v322_v58 = vmul.f32 %v600_v20, %v320_v57 }
  0x82   : > { %v353_v60 = vcombine.high %v322_v58, %v322_v58  ;;  %v355_v61 = vsel %vm350_vm9, %v322_v58, 0.0  ;;  %v357_v62 = vsel %vm348_vm6, %v322_v58, 0.0 }
  0x83   : > { %v366_v1 = vsel %vm271_vm1, %v355_v61, 0.0  ;;  %v363_v2 = vadd.f32 %v530_v59, %v357_v62 }
  0x84   : > { %v356_v3 = vsel %vm351_vm10, %v353_v60, 0.0  ;;  %v358_v4 = vsel %vm349_vm8, %v353_v60, 0.0 }
  0x85   : > { %v367_v5 = vsel %vm271_vm1, %v356_v3, 0.0  ;;  %v364_v6 = vadd.f32 %v531_v63, %v358_v4  ;;  %v375_v7 = vsel %vm271_vm1, %v363_v2, 0.0 }
  0x86   : > { %v368_v8 = vadd.f32 %v367_v5, %v366_v1 }
  0x87   : > { %v376_v9 = vsel %vm271_vm1, %v364_v6, 0.0 }
  0x88   : > { %369 = vadd.xlane.f32.xlu0 %v368_v8  ;;  %v377_v10 = vadd.f32 %v376_v9, %v375_v7 }
  0x8c   : > { %378 = vadd.xlane.f32.xlu0 %v377_v10 }
 0x111   : > { %v370_v12 = vpop.xlane.xlu0 %369 }
 0x112   : > { %v371_v13 = vadd.f32 %v370_v12, %v365_v11 }
 0x114   : > { %373 = vst.msk [vmem:[%s858_s22] sm:$0xf] %vm262_vm0, %v371_v13 }
 0x115   : > { %v379_v15 = vpop.xlane.xlu0 %378 }
 0x116   : > { %v380_v16 = vadd.f32 %v379_v15, %v374_v14 }
 0x118   : > { %381 = vst.msk [vmem:[%s257_s27] sm:$0xf] %vm262_vm0, %v380_v16 }
 0x119 PF: > { %s20_s17 = sadd.s32 1, %s715_s17   ;;  %s911_s12 = smov %s699_s13 }
 0x11a   : > { %p17_p7 = scmp.ge.s32.totalorder %s20_s17, 4   ;;  %s912_s13 = smov %s703_s14 }
 0x11b   : > { %s913_s14 = smov %s790_s24  ;;  %s914_s15 = smov %s711_s16 }
 0x11c   : > { %s915_s16 = smov %s917_s19  ;;  %19 = sbr.rel (!%p17_p7) target bundleno = 6 (0x6), region = 97 }
 0x121   :  { %415 = vsyncpa [#allocation3], 1 }
 0x122   :  { %417 = vsyncpa [#allocation3 + $0x1], 1 }
 0x123   :  { %418 = vsyncpa [#allocation5], 1 }
 0x124   :  { %420 = vsyncpa [#allocation5 + $0x1], 1 }

</bundles_post_ra>
